<compile_context>
chip_gen: v7x
topology: tpu7x:2x2x1
jax: 0.10.0
libtpu: 0.0.40
codegen_flags: <defaults>
</compile_context>

<pallas_src>
import functools

import jax
import jax.numpy as jnp
from jax import lax
from jax.experimental import pallas as pl
from jax.experimental.pallas import tpu as pltpu

LANES = 128
SUBLANES = 8
MAX_TILE_ROWS = 4096   # 4096*128*4 B = 2 MiB per f32 input block
CHUNK_ROWS = 512       # rows per in-kernel accumulation chunk (256 KiB f32 temps)


def _bce_partial_kernel(p_ref, t_ref, psum_ref, *, tile_rows, n_valid):
    """Writes this block's partial loss sum into sublane 0 of an (8,128) block."""
    blk = pl.program_id(0)

    def chunk_sum(r0, rows, acc, masked):
        p = p_ref[pl.ds(r0, rows), :].astype(jnp.float32)
        t = t_ref[pl.ds(r0, rows), :].astype(jnp.float32)
        # Stable BCE-with-logits; clamp at 100 mirrors PyTorch's log(.) >= -100.
        z = jnp.log1p(jnp.exp(-jnp.abs(p)))
        loss = jnp.minimum(jnp.maximum(p, 0.0) - p * t + z, 100.0)
        if masked:
            # Only the last grid block runs this: masks the lane padding of the
            # final row and the garbage rows of a partial last block.
            # (int32 index math: fine for < 2^31 elements.)
            row = lax.broadcasted_iota(jnp.int32, (rows, LANES), 0)
            lane = lax.broadcasted_iota(jnp.int32, (rows, LANES), 1)
            elem = (blk * tile_rows + r0 + row) * LANES + lane
            loss = jnp.where(elem < n_valid, loss, 0.0)
        return acc + jnp.sum(loss, axis=0, keepdims=True)

    def tile_sum(masked):
        acc = jnp.zeros((1, LANES), jnp.float32)
        n_chunks = tile_rows // CHUNK_ROWS
        if n_chunks:
            def body(c, a):
                r0 = pl.multiple_of(c * CHUNK_ROWS, CHUNK_ROWS)
                return chunk_sum(r0, CHUNK_ROWS, a, masked)
            acc = lax.fori_loop(0, n_chunks, body, acc, unroll=True)
        tail = tile_rows - n_chunks * CHUNK_ROWS
        if tail:
            acc = chunk_sum(n_chunks * CHUNK_ROWS, tail, acc, masked)
        # Expand to a lane-dense (8,128) output block; partial sum in sublane 0.
        sub = lax.broadcasted_iota(jnp.int32, (SUBLANES, LANES), 0)
        return jnp.where(sub == 0, jnp.broadcast_to(acc, (SUBLANES, LANES)), 0.0)

    is_last = blk == pl.num_programs(0) - 1

    @pl.when(jnp.logical_not(is_last))
    def _():
        psum_ref[...] = tile_sum(masked=False)

    @pl.when(is_last)
    def _():
        psum_ref[...] = tile_sum(masked=True)


def binary_cross_entropy_loss_2d(probs, targets):
    """Equivalent of BinaryCrossEntropyLoss2d().forward(probs, targets)."""
    assert probs.shape == targets.shape
    n_valid = int(probs.size)

    # Keep native dtypes: the f32 cast happens inside the kernel, so HBM only
    # streams the caller's bytes (bf16 logits / int8 targets stream 2x/4x less).
    p_flat = probs.reshape(-1)
    t_flat = targets.reshape(-1)
    if t_flat.dtype == jnp.bool_:
        t_flat = t_flat.astype(jnp.int8)   # avoid 1-bit memory layout in Mosaic

    # Free reshape to (rows, 128) when numel % 128 == 0 (the common NCHW case);
    # otherwise pay one small pad copy (rare slow path), masked out in-kernel.
    rem = n_valid % LANES
    if rem:
        pad = LANES - rem
        p_flat = jnp.pad(p_flat, (0, pad))
        t_flat = jnp.pad(t_flat, (0, pad))
    n_rows = p_flat.size // LANES
    p2 = p_flat.reshape(n_rows, LANES)
    t2 = t_flat.reshape(n_rows, LANES)

    # Full-dim block for small inputs (always legal, no partial blocks);
    # 4096-row blocks otherwise, partial last block masked in-kernel.
    tile_rows = n_rows if n_rows <= MAX_TILE_ROWS else MAX_TILE_ROWS
    num_blocks = -(-n_rows // tile_rows)

    out_bytes = num_blocks * SUBLANES * LANES * 4
    cost = pl.CostEstimate(
        flops=10 * n_valid,
        transcendentals=2 * n_valid,
        bytes_accessed=int(p2.size) * p2.dtype.itemsize
        + int(t2.size) * t2.dtype.itemsize + out_bytes,
    )

    partials = pl.pallas_call(
        functools.partial(_bce_partial_kernel, tile_rows=tile_rows, n_valid=n_valid),
        out_shape=jax.ShapeDtypeStruct((num_blocks * SUBLANES, LANES), jnp.float32),
        grid=(num_blocks,),
        in_specs=[
            pl.BlockSpec((tile_rows, LANES), lambda i: (i, 0)),
            pl.BlockSpec((tile_rows, LANES), lambda i: (i, 0)),
        ],
        out_specs=pl.BlockSpec((SUBLANES, LANES), lambda i: (i, 0)),
        compiler_params=pltpu.CompilerParams(
            dimension_semantics=("parallel",),
            vmem_limit_bytes=32 * 1024 * 1024,
        ),
        cost_estimate=cost,
    )(p2, t2)

    # size_average=True -> mean over all valid elements; partials is tiny, so
    # finishing the reduction in plain JAX is negligible.
    return jnp.sum(partials) / jnp.float32(n_valid)


def _reference(probs, targets):
    # Mimics PyTorch sigmoid + BCELoss(mean) in f32 (with its -100 log clamp).
    s = jax.nn.sigmoid(probs.astype(jnp.float32)).reshape(-1)
    t = targets.astype(jnp.float32).reshape(-1)
    log_s = jnp.maximum(jnp.log(s), -100.0)
    log_1ms = jnp.maximum(jnp.log(1.0 - s), -100.0)
    return jnp.mean(-(t * log_s + (1.0 - t) * log_1ms))


if __name__ == "__main__":
    key = jax.random.PRNGKey(0)
    k1, k2, k3, k4 = jax.random.split(key, 4)

    # NCHW logits and binary targets (UNet-style), small shape.
    probs = jax.random.normal(k1, (2, 4, 16, 16), dtype=jnp.float32)
    targets = (jax.random.uniform(k2, (2, 4, 16, 16)) > 0.5).astype(jnp.float32)
    loss = jax.block_until_ready(binary_cross_entropy_loss_2d(probs, targets))
    ref = _reference(probs, targets)
    assert jnp.allclose(loss, ref, rtol=1e-5, atol=1e-6), (loss, ref)

    # Ragged size (numel % 128 != 0) + bf16 logits: exercises the in-kernel
    # tail mask and native-dtype streaming.
    probs2 = jax.random.normal(k3, (2, 3, 10, 10), dtype=jnp.bfloat16)
    targets2 = (jax.random.uniform(k4, (2, 3, 10, 10)) > 0.5).astype(jnp.float32)
    loss2 = jax.block_until_ready(binary_cross_entropy_loss_2d(probs2, targets2))
    ref2 = _reference(probs2.astype(jnp.float32), targets2)
    assert jnp.allclose(loss2, ref2, rtol=1e-4, atol=1e-5), (loss2, ref2)

    print("KERNEL_OK")
</pallas_src>

<mosaic_0001>
module attributes {stable_mosaic.version = 11 : i64} {
  func.func @_bce_partial_kernel(%arg0: i32, %arg1: memref<16x128xf32, #tpu.memory_space<vmem>>, %arg2: memref<16x128xf32, #tpu.memory_space<vmem>>, %arg3: memref<8x128xf32, #tpu.memory_space<vmem>>) attributes {dimension_semantics = [#tpu.dimension_semantics<parallel>], iteration_bounds = array<i64: 1>, scalar_prefetch = 0 : i64, scratch_operands = 0 : i64, tpu.core_type = #tpu.core_type<tc>, window_params = [{transform_indices = @transform_0, window_bounds = array<i64: 16, 128>}, {transform_indices = @transform_1, window_bounds = array<i64: 16, 128>}, {transform_indices = @transform_2, window_bounds = array<i64: 8, 128>}]} {
    %c0_i32 = arith.constant 0 : i32
    %0 = arith.cmpi eq, %arg0, %c0_i32 : i32
    %true = arith.constant true
    %1 = arith.xori %0, %true : i1
    %2 = arith.extui %1 : i1 to i32
    %c0_i32_0 = arith.constant 0 : i32
    %3 = arith.cmpi ne, %2, %c0_i32_0 : i32
    scf.if %3 {
      %cst = arith.constant 0.000000e+00 : f32
      %6 = vector.broadcast %cst : f32 to vector<1x128xf32>
      %c0 = arith.constant 0 : index
      %c0_2 = arith.constant 0 : index
      %7 = vector.load %arg1[%c0, %c0_2] : memref<16x128xf32, #tpu.memory_space<vmem>>, vector<16x128xf32>
      %c0_3 = arith.constant 0 : index
      %c0_4 = arith.constant 0 : index
      %8 = vector.load %arg2[%c0_3, %c0_4] : memref<16x128xf32, #tpu.memory_space<vmem>>, vector<16x128xf32>
      %9 = math.absf %7 : vector<16x128xf32>
      %cst_5 = arith.constant 0.000000e+00 : f32
      %10 = vector.broadcast %cst_5 : f32 to vector<16x128xf32>
      %11 = arith.subf %10, %9 : vector<16x128xf32>
      %12 = math.exp %11 : vector<16x128xf32>
      %13 = math.log1p %12 : vector<16x128xf32>
      %cst_6 = arith.constant 0.000000e+00 : f32
      %14 = vector.broadcast %cst_6 : f32 to vector<16x128xf32>
      %15 = arith.maximumf %7, %14 : vector<16x128xf32>
      %16 = arith.mulf %7, %8 : vector<16x128xf32>
      %17 = arith.subf %15, %16 : vector<16x128xf32>
      %18 = arith.addf %17, %13 : vector<16x128xf32>
      %cst_7 = arith.constant 1.000000e+02 : f32
      %19 = vector.broadcast %cst_7 : f32 to vector<16x128xf32>
      %20 = arith.minimumf %18, %19 : vector<16x128xf32>
      %cst_8 = arith.constant dense<0.000000e+00> : vector<128xf32>
      %21 = vector.multi_reduction <add>, %20, %cst_8 [0] : vector<16x128xf32> to vector<128xf32>
      %22 = vector.shape_cast %21 : vector<128xf32> to vector<1x128xf32>
      %23 = arith.addf %6, %22 : vector<1x128xf32>
      %24 = tpu.iota {dimensions = array<i32: 0>} : vector<8x128xi32>
      %c0_i32_9 = arith.constant 0 : i32
      %25 = vector.broadcast %c0_i32_9 : i32 to vector<8x128xi32>
      %26 = arith.cmpi eq, %24, %25 : vector<8x128xi32>
      %27 = vector.shape_cast %23 : vector<1x128xf32> to vector<1x128xf32>
      %28 = vector.broadcast %27 : vector<1x128xf32> to vector<8x128xf32>
      %cst_10 = arith.constant 0.000000e+00 : f32
      %29 = vector.broadcast %cst_10 : f32 to vector<8x128xf32>
      %30 = arith.select %26, %28, %29 : vector<8x128xi1>, vector<8x128xf32>
      %c0_11 = arith.constant 0 : index
      %c0_12 = arith.constant 0 : index
      %31 = vector.load %arg3[%c0_11, %c0_12] : memref<8x128xf32, #tpu.memory_space<vmem>>, vector<8x128xf32>
      tpu.vector_store %arg3[%c0_11, %c0_12], %30 {strides = array<i32>} : memref<8x128xf32, #tpu.memory_space<vmem>>, vector<8x128xf32>,
    } else {
    }
    %4 = arith.extui %0 : i1 to i32
    %c0_i32_1 = arith.constant 0 : i32
    %5 = arith.cmpi ne, %4, %c0_i32_1 : i32
    scf.if %5 {
      %cst = arith.constant 0.000000e+00 : f32
      %6 = vector.broadcast %cst : f32 to vector<1x128xf32>
      %c0 = arith.constant 0 : index
      %c0_2 = arith.constant 0 : index
      %7 = vector.load %arg1[%c0, %c0_2] : memref<16x128xf32, #tpu.memory_space<vmem>>, vector<16x128xf32>
      %c0_3 = arith.constant 0 : index
      %c0_4 = arith.constant 0 : index
      %8 = vector.load %arg2[%c0_3, %c0_4] : memref<16x128xf32, #tpu.memory_space<vmem>>, vector<16x128xf32>
      %9 = math.absf %7 : vector<16x128xf32>
      %cst_5 = arith.constant 0.000000e+00 : f32
      %10 = vector.broadcast %cst_5 : f32 to vector<16x128xf32>
      %11 = arith.subf %10, %9 : vector<16x128xf32>
      %12 = math.exp %11 : vector<16x128xf32>
      %13 = math.log1p %12 : vector<16x128xf32>
      %cst_6 = arith.constant 0.000000e+00 : f32
      %14 = vector.broadcast %cst_6 : f32 to vector<16x128xf32>
      %15 = arith.maximumf %7, %14 : vector<16x128xf32>
      %16 = arith.mulf %7, %8 : vector<16x128xf32>
      %17 = arith.subf %15, %16 : vector<16x128xf32>
      %18 = arith.addf %17, %13 : vector<16x128xf32>
      %cst_7 = arith.constant 1.000000e+02 : f32
      %19 = vector.broadcast %cst_7 : f32 to vector<16x128xf32>
      %20 = arith.minimumf %18, %19 : vector<16x128xf32>
      %21 = tpu.iota {dimensions = array<i32: 0>} : vector<16x128xi32>
      %22 = tpu.iota {dimensions = array<i32: 1>} : vector<16x128xi32>
      %c16_i32 = arith.constant 16 : i32
      %23 = arith.muli %arg0, %c16_i32 : i32
      %c0_i32_8 = arith.constant 0 : i32
      %24 = arith.addi %23, %c0_i32_8 : i32
      %25 = vector.broadcast %24 : i32 to vector<16x128xi32>
      %26 = arith.addi %25, %21 : vector<16x128xi32>
      %c128_i32 = arith.constant 128 : i32
      %27 = vector.broadcast %c128_i32 : i32 to vector<16x128xi32>
      %28 = arith.muli %26, %27 : vector<16x128xi32>
      %29 = arith.addi %28, %22 : vector<16x128xi32>
      %c2048_i32 = arith.constant 2048 : i32
      %30 = vector.broadcast %c2048_i32 : i32 to vector<16x128xi32>
      %31 = arith.cmpi slt, %29, %30 : vector<16x128xi32>
      %cst_9 = arith.constant 0.000000e+00 : f32
      %32 = vector.broadcast %cst_9 : f32 to vector<16x128xf32>
      %33 = arith.select %31, %20, %32 : vector<16x128xi1>, vector<16x128xf32>
      %cst_10 = arith.constant dense<0.000000e+00> : vector<128xf32>
      %34 = vector.multi_reduction <add>, %33, %cst_10 [0] : vector<16x128xf32> to vector<128xf32>
      %35 = vector.shape_cast %34 : vector<128xf32> to vector<1x128xf32>
      %36 = arith.addf %6, %35 : vector<1x128xf32>
      %37 = tpu.iota {dimensions = array<i32: 0>} : vector<8x128xi32>
      %c0_i32_11 = arith.constant 0 : i32
      %38 = vector.broadcast %c0_i32_11 : i32 to vector<8x128xi32>
      %39 = arith.cmpi eq, %37, %38 : vector<8x128xi32>
      %40 = vector.shape_cast %36 : vector<1x128xf32> to vector<1x128xf32>
      %41 = vector.broadcast %40 : vector<1x128xf32> to vector<8x128xf32>
      %cst_12 = arith.constant 0.000000e+00 : f32
      %42 = vector.broadcast %cst_12 : f32 to vector<8x128xf32>
      %43 = arith.select %39, %41, %42 : vector<8x128xi1>, vector<8x128xf32>
      %c0_13 = arith.constant 0 : index
      %c0_14 = arith.constant 0 : index
      %44 = vector.load %arg3[%c0_13, %c0_14] : memref<8x128xf32, #tpu.memory_space<vmem>>, vector<8x128xf32>
      tpu.vector_store %arg3[%c0_13, %c0_14], %43 {strides = array<i32>} : memref<8x128xf32, #tpu.memory_space<vmem>>, vector<8x128xf32>,
    } else {
    }
    return
  }
  func.func @transform_0(%arg0: i32) -> (i32, i32) {
    %c0_i32 = arith.constant 0 : i32
    %c0_i32_0 = arith.constant 0 : i32
    return %arg0, %c0_i32 : i32, i32
  }
  func.func @transform_1(%arg0: i32) -> (i32, i32) {
    %c0_i32 = arith.constant 0 : i32
    %c0_i32_0 = arith.constant 0 : i32
    return %arg0, %c0_i32 : i32, i32
  }
  func.func @transform_2(%arg0: i32) -> (i32, i32) {
    %c0_i32 = arith.constant 0 : i32
    %c0_i32_0 = arith.constant 0 : i32
    return %arg0, %c0_i32 : i32, i32
  }
}

</mosaic_0001>

<bundles_post_ra>
// kernel: tpu_custom_call.1
= control target key start
LH: loop header
LB: loop body
LE: loop exit
PB: predicated region body
PF: predicated region fallthrough
CT: control target
= control target key end

     0   :  { %7 = vsyncpa [#allocation3], 0  ;;  %s326_s0 = inlined_call_operand.hbm [shape: f32[16,128], index: 0, kind: input, shape index: {}]   ;;  %s327_s1 = inlined_call_operand.hbm [shape: f32[16,128], index: 1, kind: input, shape index: {}]   ;;  %s328_s2 = inlined_call_operand.hbm [shape: f32[8,128], index: 2, kind: output, shape index: {}]  }
   0x1   :  { %8 = vsyncpa [#allocation6], 0 }
   0x2   :  { %9 = vsyncpa [#allocation4], 0  ;;  %s270_s9 = smov [#allocation2]   ;;  %s198_s13 = scalar_lea.hbm %s326_s0, 256 }
   0x3   :  { %s15_s10 = sshll.u32 %s270_s9, 4  ;;  %p199_p0 = scmp.ne.s32.totalorder %s326_s0, %s198_s13  ;;  %s16_s10 = int_to_ptr.vmem [resolvable:$true] %s15_s10 }
   0x4   :  { %p202_p1 = scmp.lt.u32.totalorder %s198_s13, %s326_s0 }
   0x6   :  { %p204_p2 = pnand %p202_p1, %p199_p0 }
   0x8   :  { %207 = shalt.err (!%p204_p2)
}
   0x9   :  { %s208_s18 = scalar_lea.vmem %s16_s10, 256  ;;  %p213_p4 = scmp.lt.s32.totalorder %s16_s10, %s16_s10 }
   0xa   :  { %p209_p3 = scmp.ne.s32.totalorder %s16_s10, %s208_s18  ;;  %p214_p5 = scmp.lt.s32.totalorder %s208_s18, %s208_s18 }
   0xc   :  { %p215_p6 = por %p214_p5, %p213_p4 }
   0xe   :  { %p216_p7 = pnand %p215_p6, %p209_p3 }
  0x10   :  { %219 = shalt.err (!%p216_p7)
}
  0x11   :  { %s271_s19 = smov 128   ;;  %s272_s20 = smov 8  }
  0x12   :  { %21 = dma.hbm_to_vmem [thread:$0]  %s326_s0, 256, %s16_s10, [#allocation3], %s271_s19, %s271_s19, %s272_s20  }
  0x13   :  { %s273_s23 = smov [#allocation5]   ;;  %s220_s27 = scalar_lea.hbm %s327_s1, 256 }
  0x14   :  { %s27_s24 = sshll.u32 %s273_s23, 4  ;;  %p221_p8 = scmp.ne.s32.totalorder %s327_s1, %s220_s27  ;;  %s28_s24 = int_to_ptr.vmem [resolvable:$true] %s27_s24 }
  0x15   :  { %p224_p9 = scmp.lt.u32.totalorder %s220_s27, %s327_s1 }
  0x17   :  { %p226_p10 = pnand %p224_p9, %p221_p8 }
  0x19   :  { %229 = shalt.err (!%p226_p10)
}
  0x1a   :  { %s230_s4 = scalar_lea.vmem %s28_s24, 256  ;;  %p235_p12 = scmp.lt.s32.totalorder %s28_s24, %s28_s24 }
  0x1b   :  { %p231_p11 = scmp.ne.s32.totalorder %s28_s24, %s230_s4  ;;  %p236_p13 = scmp.lt.s32.totalorder %s230_s4, %s230_s4 }
  0x1d   :  { %p237_p0 = por %p236_p13, %p235_p12 }
  0x1f   :  { %p238_p1 = pnand %p237_p0, %p231_p11 }
  0x21   :  { %241 = shalt.err (!%p238_p1)
}
  0x22   :  { %33 = dma.hbm_to_vmem [thread:$0]  %s327_s1, 256, %s28_s24, [#allocation6], %s271_s19, %s271_s19, %s272_s20  }
  0x23   :  { %264 = dma.done.wait [#allocation3], 256  }
  0x24   :  { %265 = vsyncadd [#allocation3], 4294967040 }
  0x25   :  { %266 = dma.done.wait [#allocation6], 256  }
  0x26   :  { %267 = vsyncadd [#allocation6], 4294967040  ;;  %v101_v0 = vld [vmem:[#allocation2] sm:$0xff]  ;;  %v102_v1 = vld [vmem:[#allocation2 + $0x8] sm:$0xff]  ;;  %v141_v8 = vlaneseq  ;;  %s274_s1 = smov [#allocation7]  }
  0x27   :  { %v105_v2 = vand.u32 2147483647, %v101_v0  ;;  %v106_v3 = vand.u32 2147483647, %v102_v1  ;;  %v103_v16 = vld [vmem:[#allocation5] sm:$0xff]  ;;  %v104_v17 = vld [vmem:[#allocation5 + $0x8] sm:$0xff] }
  0x28   :  { %v142_v13 = vshrl.u32 %v141_v8, 7  ;;  %v145_v20 = vand.u32 127, %v141_v8  ;;  %v131_v23 = vmax.f32 %v101_v0, 0.0  ;;  %v133_v24 = vmul.f32 %v103_v16, %v101_v0  ;;  %s175_s6 = sshll.u32 %s274_s1, 4  ;;  %s176_s6 = int_to_ptr.vmem [resolvable:$true] %s175_s6 }
  0x29   :  { %v107_v4 = vsub.f32 0.0, %v105_v2  ;;  %v108_v5 = vsub.f32 0.0, %v106_v3  ;;  %v132_v26 = vmax.f32 %v102_v1, 0.0  ;;  %v134_v27 = vmul.f32 %v104_v17, %v102_v1  ;;  %s242_s7 = scalar_lea.vmem %s176_s6, 128  ;;  %p247_p3 = scmp.lt.s32.totalorder %s176_s6, %s176_s6 }
  0x2a   :  { %v143_v18 = vadd.s32 8, %v142_v13  ;;  %v150_v28 = vmul.u32 128, %v142_v13  ;;  %v135_v33 = vsub.f32 %v131_v23, %v133_v24  ;;  %vm166_vm4 = vcmp.eq.s32.totalorder %v142_v13, 0  ;;  %p243_p2 = scmp.ne.s32.totalorder %s176_s6, %s242_s7  ;;  %p248_p4 = scmp.lt.s32.totalorder %s242_s7, %s242_s7 }
  0x2b   :  { %v109_v6 = vmul.f32 1.442695, %v107_v4  ;;  %v111_v7 = vmul.f32 1.442695, %v108_v5  ;;  %v136_v36 = vsub.f32 %v132_v26, %v134_v27 }
  0x2c   :  { %v151_v29 = vmul.u32 128, %v143_v18  ;;  %v152_v37 = vadd.s32 %v150_v28, %v145_v20  ;;  %p249_p5 = por %p248_p4, %p247_p3 }
  0x2d   :  { %190 = vpow2.f32 %v109_v6 }
  0x2e   :  { %192 = vpow2.f32 %v111_v7  ;;  %v153_v39 = vadd.s32 %v151_v29, %v145_v20  ;;  %vm154_vm2 = vcmp.lt.s32.totalorder %v152_v37, 2048  ;;  %p250_p6 = pnand %p249_p5, %p243_p2 }
  0x30   :  { %vm155_vm3 = vcmp.lt.s32.totalorder %v153_v39, 2048 }
  0x37   :  { %v191_v9 = vpop.eup %190 }
  0x38   :  { %v193_v10 = vpop.eup %192  ;;  %v113_v11 = vadd.f32 1.0, %v191_v9  ;;  %v116_v14 = vmul.f32 -0.5, %v191_v9  ;;  %v119_v21 = vand.u32 2147483647, %v191_v9 }
  0x39   :  { %v122_v12 = vadd.f32 1.0, %v193_v10  ;;  %v125_v15 = vmul.f32 -0.5, %v193_v10  ;;  %v128_v25 = vand.u32 2147483647, %v193_v10 }
  0x3a   :  { %194 = vlog2.f32 %v113_v11  ;;  %v117_v19 = vadd.f32 1.0, %v116_v14  ;;  %vm120_vm0 = vcmp.lt.f32.partialorder %v119_v21, 0.0004427343 }
  0x3b   :  { %196 = vlog2.f32 %v122_v12  ;;  %v126_v22 = vadd.f32 1.0, %v125_v15  ;;  %vm129_vm1 = vcmp.lt.f32.partialorder %v128_v25, 0.0004427343 }
  0x3c   :  { %v118_v30 = vmul.f32 %v191_v9, %v117_v19 }
  0x3d   :  { %v127_v32 = vmul.f32 %v193_v10, %v126_v22 }
  0x44   :  { %v195_v31 = vpop.eup %194 }
  0x45   :  { %v197_v34 = vpop.eup %196  ;;  %v115_v35 = vmul.f32 0.6931472, %v195_v31 }
  0x46   :  { %v124_v38 = vmul.f32 0.6931472, %v197_v34 }
  0x47   :  { %v121_v40 = vsel %vm120_vm0, %v118_v30, %v115_v35 }
  0x48   :  { %v130_v41 = vsel %vm129_vm1, %v127_v32, %v124_v38  ;;  %v137_v42 = vadd.f32 %v135_v33, %v121_v40 }
  0x49   :  { %v138_v43 = vadd.f32 %v136_v36, %v130_v41 }
  0x4a   :  { %v139_v44 = vmin.f32 %v137_v42, 100.0 }
  0x4b   :  { %v140_v45 = vmin.f32 %v138_v43, 100.0 }
  0x4c   :  { %v156_v46 = vsel %vm154_vm2, %v139_v44, 0.0 }
  0x4d   :  { %v157_v47 = vsel %vm155_vm3, %v140_v45, 0.0 }
  0x4e   :  { %v158_v48 = vadd.f32 %v157_v47, %v156_v46 }
  0x50   :  { %v159_v49 = vrot.slane %v158_v48, 4 }
  0x52   :  { %v160_v50 = vadd.f32 %v159_v49, %v158_v48 }
  0x54   :  { %v161_v51 = vrot.slane %v160_v50, 2 }
  0x56   :  { %v162_v52 = vadd.f32 %v161_v51, %v160_v50 }
  0x58   :  { %v163_v53 = vrot.slane %v162_v52, 1 }
  0x5a   :  { %v164_v54 = vadd.f32 %v163_v53, %v162_v52 }
  0x5c   :  { %v167_v55 = vsel %vm166_vm4, %v164_v54, 0.0 }
  0x5d   :  { %168 = vst [vmem:[#allocation7] sm:$0xff] %v167_v55 }
  0x5e   :  { %253 = shalt.err (!%p250_p6)
}
  0x5f   :  { %s254_s10 = scalar_lea.hbm %s328_s2, 128 }
  0x60   :  { %p255_p7 = scmp.ne.s32.totalorder %s328_s2, %s254_s10  ;;  %p258_p8 = scmp.lt.u32.totalorder %s254_s10, %s328_s2 }
  0x62   :  { %p260_p9 = pnand %p258_p8, %p255_p7 }
  0x64   :  { %263 = shalt.err (!%p260_p9)
}
  0x65   :  { %178 = dma.vmem_to_hbm [thread:$0]  %s176_s6, 128, %s328_s2, [#allocation4]  }
  0x66   :  { %268 = dma.done.wait [#allocation4], 128  }
  0x67   :  { %269 = vsyncadd [#allocation4], 4294967168 }
  0x68   :  { %182 = vsyncpa [#allocation3], 1 }
  0x69   :  { %183 = vsyncpa [#allocation6], 1 }
  0x6a   :  { %184 = vsyncpa [#allocation4], 1 }

</bundles_post_ra>
